<compile_context>
chip_gen: v7x
topology: tpu7x:2x2x1
jax: 0.10.0
libtpu: 0.0.40
codegen_flags: <defaults>
</compile_context>

<pallas_src>
import jax
import jax.numpy as jnp
from jax.experimental import pallas as pl
from jax.experimental.pallas import tpu as pltpu

LN_EPS = 1e-5  # PyTorch nn.LayerNorm default


def _round_up(n, m):
    return ((n + m - 1) // m) * m


def _layernorm(z, gamma, beta):
    mu = jnp.mean(z, axis=-1, keepdims=True)
    var = jnp.mean((z - mu) ** 2, axis=-1, keepdims=True)  # population variance
    return (z - mu) * jax.lax.rsqrt(var + LN_EPS) * gamma + beta


def prior_kernel(x_ref, w_ref, vec_ref, total_ref, cpm_ref):
    x = x_ref[0]                                # (B, D) f32, one episode
    D = x.shape[1]
    Dp = total_ref.shape[-1] // 2               # 128-aligned stride of Q/K/V blocks

    vec = vec_ref[...]                          # (8, Np) f32, packed small vectors
    b_qkv = vec[0:1, :]                         # fused [bq*scale | bk | bv | 0...] bias
    g1 = vec[1:2, 0:D]
    b1 = vec[2:3, 0:D]
    g2 = vec[3:4, 0:D]
    b2 = vec[4:5, 0:D]

    # Fused Q/K/V projection: one MXU push, bf16 inputs, f32 accumulation.
    # The 1/sqrt(D) logits scale is pre-folded into the Q columns / bias.
    qkv = jnp.dot(x.astype(jnp.bfloat16), w_ref[...],
                  preferred_element_type=jnp.float32) + b_qkv      # (B, Np)
    q = qkv[:, 0:D]                             # already scaled
    k = qkv[:, Dp:Dp + D]                       # 128-aligned block start
    v = qkv[:, 2 * Dp:2 * Dp + D]               # 128-aligned block start

    # context_prior_map = sigmoid(Q_scaled K^T); contract dim 1 of both operands
    # so no explicit transpose of K is materialized.
    logits = jax.lax.dot_general(
        q.astype(jnp.bfloat16), k.astype(jnp.bfloat16),
        dimension_numbers=(((1,), (1,)), ((), ())),
        preferred_element_type=jnp.float32)
    cpm = jax.nn.sigmoid(logits)                # (B, B)
    cpm_ref[0] = cpm

    # softmax over dim=1. cpm is bounded in (0,1) -> exp cannot overflow, so
    # skip the max-subtraction; put the divide on the EUP.
    e = jnp.exp(cpm)
    attn = e * pl.reciprocal(jnp.sum(e, axis=1, keepdims=True), approx=True)

    # intra_context = softmax(cpm) @ V
    intra = jnp.dot(attn.astype(jnp.bfloat16), v.astype(jnp.bfloat16),
                    preferred_element_type=jnp.float32)            # (B, D)

    # Final concat layout written directly: LN1(intra) at lane 0, LN2(x) at
    # lane Dp (both 128-aligned block starts; exact (B, 2D) when D % 128 == 0).
    total_ref[0, :, 0:D] = _layernorm(intra, g1, b1)
    total_ref[0, :, Dp:Dp + D] = _layernorm(x, g2, b2)


def prepare_params(params):
    """One-time packing of Prior parameters (hoisted out of the hot path):
    fused, 128-block-aligned, MXU-width-padded bf16 QKV weight (logits scale
    folded into the Q block) + one (8, Np) f32 slab holding the fused bias and
    both LayerNorm affines."""
    wq, bq, wk, bk, wv, bv, g1, b1, g2, b2 = params
    D = wq.shape[0]
    Dp = _round_up(D, 128)              # each of Q/K/V starts on a 128-lane boundary
    Np = _round_up(3 * Dp, 256)         # fused out-dim padded for 256-wide v6e/v7x MXU

    scale = 1.0 / (D ** 0.5)            # fold logits scale into Wq / bq (pre-bf16-cast)
    # PyTorch Linear stores W as (out, in); pre-transpose so the kernel does x @ W.
    w_qkv = jnp.zeros((D, Np), jnp.float32)
    w_qkv = (w_qkv.at[:, 0:D].set(wq.T * scale)
                  .at[:, Dp:Dp + D].set(wk.T)
                  .at[:, 2 * Dp:2 * Dp + D].set(wv.T)).astype(jnp.bfloat16)

    vecs = jnp.zeros((8, Np), jnp.float32)
    vecs = (vecs.at[0, 0:D].set(bq * scale)
                .at[0, Dp:Dp + D].set(bk)
                .at[0, 2 * Dp:2 * Dp + D].set(bv)
                .at[1, 0:D].set(g1).at[2, 0:D].set(b1)
                .at[3, 0:D].set(g2).at[4, 0:D].set(b2))
    return w_qkv, vecs


def prior_forward(x_eb, w_qkv, vecs):
    """Batched-episode forward.
    x_eb: (E, B, C, H, W) (or (E, B, D)) with C*H*W == in_planes.
    Returns (total: (E, B, 2D), cpm: (E, B, B))."""
    E, B = x_eb.shape[0], x_eb.shape[1]
    x = x_eb.reshape(E, B, -1).astype(jnp.float32)      # glue: view(B, -1) per episode
    D = x.shape[-1]
    Dp = _round_up(D, 128)
    Tp = 2 * Dp
    Np = w_qkv.shape[1]

    cost = pl.CostEstimate(
        flops=int(E * (2 * B * D * Np + 4 * B * B * D + 12 * B * D)),
        transcendentals=int(E * (2 * B * B + 3 * B)),
        bytes_accessed=int(x.size * 4 + w_qkv.size * 2 + vecs.size * 4
                           + E * B * Tp * 4 + E * B * B * 4),
    )

    grid_spec = pltpu.PrefetchScalarGridSpec(
        num_scalar_prefetch=0,
        grid=(E,),
        in_specs=[
            pl.BlockSpec((1, B, D), lambda e: (e, 0, 0)),   # per-episode activations
            pl.BlockSpec((D, Np), lambda e: (0, 0)),        # shared weights (resident)
            pl.BlockSpec((8, Np), lambda e: (0, 0)),        # shared bias/affine slab
        ],
        out_specs=(
            pl.BlockSpec((1, B, Tp), lambda e: (e, 0, 0)),  # concat-layout slab
            pl.BlockSpec((1, B, B), lambda e: (e, 0, 0)),
        ),
    )

    total_slab, cpm = pl.pallas_call(
        prior_kernel,
        out_shape=(
            jax.ShapeDtypeStruct((E, B, Tp), jnp.float32),
            jax.ShapeDtypeStruct((E, B, B), jnp.float32),
        ),
        grid_spec=grid_spec,
        compiler_params=pltpu.CompilerParams(
            dimension_semantics=("parallel",)),              # 2 TCs on v7x
        cost_estimate=cost,
    )(x, w_qkv, vecs)

    if Dp == D:
        # Realistic in_planes (multiple of 128, e.g. 640): slab is exactly the
        # (B, 2D) concat layout -> no wrapper op at all.
        total = total_slab
    else:
        # Toy / unaligned D: drop the per-block lane padding.
        total = jnp.concatenate(
            [total_slab[:, :, :D], total_slab[:, :, Dp:Dp + D]], axis=-1)
    return total, cpm


def prior_forward_single(x_bchw, w_qkv, vecs):
    """Single-episode interface matching the PyTorch module's forward."""
    total, cpm = prior_forward(x_bchw[None], w_qkv, vecs)
    return total[0], cpm[0]


def make_params(key, in_planes):
    """Deterministic synthetic parameters matching Prior.__init__ shapes."""
    ks = jax.random.split(key, 10)
    D = in_planes
    lim = 1.0 / (D ** 0.5)
    wq = jax.random.uniform(ks[0], (D, D), jnp.float32, -lim, lim)
    bq = jax.random.uniform(ks[1], (D,), jnp.float32, -lim, lim)
    wk = jax.random.uniform(ks[2], (D, D), jnp.float32, -lim, lim)
    bk = jax.random.uniform(ks[3], (D,), jnp.float32, -lim, lim)
    wv = jax.random.uniform(ks[4], (D, D), jnp.float32, -lim, lim)
    bv = jax.random.uniform(ks[5], (D,), jnp.float32, -lim, lim)
    g1 = 1.0 + 0.1 * jax.random.normal(ks[6], (D,), jnp.float32)
    b1 = 0.1 * jax.random.normal(ks[7], (D,), jnp.float32)
    g2 = 1.0 + 0.1 * jax.random.normal(ks[8], (D,), jnp.float32)
    b2 = 0.1 * jax.random.normal(ks[9], (D,), jnp.float32)
    return (wq, bq, wk, bk, wv, bv, g1, b1, g2, b2)


def prior_reference(x_nchw, params):
    """Pure-JAX f32 reference mirroring the PyTorch forward, for verification."""
    B = x_nchw.shape[0]
    x = x_nchw.reshape(B, -1).astype(jnp.float32)
    D = x.shape[1]
    wq, bq, wk, bk, wv, bv, g1, b1, g2, b2 = params
    Q = x @ wq.T + bq
    K = x @ wk.T + bk
    V = x @ wv.T + bv
    cpm = jax.nn.sigmoid((Q @ K.T) / (D ** 0.5))
    intra = jax.nn.softmax(cpm, axis=1) @ V
    total = jnp.concatenate([_layernorm(intra, g1, b1), _layernorm(x, g2, b2)], axis=1)
    return total, cpm


if __name__ == "__main__":
    # E episodes of B=8 samples each; in_planes = C*H*W = 32 (post-avgpool NCHW).
    E, B, C, H, W = 4, 8, 32, 1, 1
    key = jax.random.PRNGKey(0)
    kx, kp = jax.random.split(key)
    x = jax.random.normal(kx, (E, B, C, H, W), jnp.float32)
    params = make_params(kp, C * H * W)

    w_qkv, vecs = prepare_params(params)        # one-time packing (not per call)

    total, cpm = prior_forward(x, w_qkv, vecs)
    jax.block_until_ready((total, cpm))

    D = C * H * W
    assert total.shape == (E, B, 2 * D) and cpm.shape == (E, B, B)
    # Tolerances relaxed vs. the pure-f32 reference because the MXU inputs are
    # bf16 (f32 accumulation) and the softmax denominator uses approx reciprocal.
    for e in range(E):
        t_ref, c_ref = prior_reference(x[e], params)
        assert jnp.allclose(cpm[e], c_ref, atol=2e-2, rtol=2e-2)
        assert jnp.allclose(total[e], t_ref, atol=5e-2, rtol=5e-2)
    print("KERNEL_OK")
</pallas_src>

<mosaic_0001>
module attributes {stable_mosaic.version = 11 : i64} {
  func.func @prior_kernel(%arg0: i32, %arg1: memref<1x8x32xf32, #tpu.memory_space<vmem>>, %arg2: memref<32x512xbf16, #tpu.memory_space<vmem>>, %arg3: memref<8x512xf32, #tpu.memory_space<vmem>>, %arg4: memref<1x8x256xf32, #tpu.memory_space<vmem>>, %arg5: memref<1x8x8xf32, #tpu.memory_space<vmem>>) attributes {dimension_semantics = [#tpu.dimension_semantics<parallel>], iteration_bounds = array<i64: 4>, scalar_prefetch = 0 : i64, scratch_operands = 0 : i64, tpu.core_type = #tpu.core_type<tc>, window_params = [{transform_indices = @transform_0, window_bounds = array<i64: 1, 8, 32>}, {pipeline_mode = #tpu.pipeline_mode<synchronous>, transform_indices = @transform_1, window_bounds = array<i64: 32, 512>}, {pipeline_mode = #tpu.pipeline_mode<synchronous>, transform_indices = @transform_2, window_bounds = array<i64: 8, 512>}, {transform_indices = @transform_3, window_bounds = array<i64: 1, 8, 256>}, {transform_indices = @transform_4, window_bounds = array<i64: 1, 8, 8>}]} {
    %c0 = arith.constant 0 : index
    %c0_0 = arith.constant 0 : index
    %c0_1 = arith.constant 0 : index
    %0 = vector.load %arg1[%c0, %c0_0, %c0_1] : memref<1x8x32xf32, #tpu.memory_space<vmem>>, vector<1x8x32xf32>
    %1 = vector.shape_cast %0 : vector<1x8x32xf32> to vector<8x32xf32>
    %c0_2 = arith.constant 0 : index
    %c0_3 = arith.constant 0 : index
    %2 = vector.load %arg3[%c0_2, %c0_3] : memref<8x512xf32, #tpu.memory_space<vmem>>, vector<8x512xf32>
    %3 = vector.extract_strided_slice %2 {offsets = [0, 0], sizes = [1, 512], strides = [1, 1]} : vector<8x512xf32> to vector<1x512xf32>
    %4 = vector.extract_strided_slice %2 {offsets = [1, 0], sizes = [1, 32], strides = [1, 1]} : vector<8x512xf32> to vector<1x32xf32>
    %5 = vector.extract_strided_slice %2 {offsets = [2, 0], sizes = [1, 32], strides = [1, 1]} : vector<8x512xf32> to vector<1x32xf32>
    %6 = vector.extract_strided_slice %2 {offsets = [3, 0], sizes = [1, 32], strides = [1, 1]} : vector<8x512xf32> to vector<1x32xf32>
    %7 = vector.extract_strided_slice %2 {offsets = [4, 0], sizes = [1, 32], strides = [1, 1]} : vector<8x512xf32> to vector<1x32xf32>
    %8 = arith.truncf %1 : vector<8x32xf32> to vector<8x32xbf16>
    %c0_4 = arith.constant 0 : index
    %c0_5 = arith.constant 0 : index
    %9 = vector.load %arg2[%c0_4, %c0_5] : memref<32x512xbf16, #tpu.memory_space<vmem>>, vector<32x512xbf16>
    %cst = arith.constant dense<0.000000e+00> : vector<8x512xf32>
    %10 = tpu.matmul %8, %9, %cst {dimension_numbers = #tpu.dot_dimension_numbers<[1], [0], [0], [1], [0, 0, 1, 1], [], []>} : vector<8x32xbf16>, vector<32x512xbf16>, vector<8x512xf32> -> vector<8x512xf32>
    %11 = vector.broadcast %3 : vector<1x512xf32> to vector<8x512xf32>
    %12 = arith.addf %10, %11 : vector<8x512xf32>
    %13 = vector.extract_strided_slice %12 {offsets = [0, 0], sizes = [8, 32], strides = [1, 1]} : vector<8x512xf32> to vector<8x32xf32>
    %14 = vector.extract_strided_slice %12 {offsets = [0, 128], sizes = [8, 32], strides = [1, 1]} : vector<8x512xf32> to vector<8x32xf32>
    %15 = vector.extract_strided_slice %12 {offsets = [0, 256], sizes = [8, 32], strides = [1, 1]} : vector<8x512xf32> to vector<8x32xf32>
    %16 = arith.truncf %13 : vector<8x32xf32> to vector<8x32xbf16>
    %17 = arith.truncf %14 : vector<8x32xf32> to vector<8x32xbf16>
    %cst_6 = arith.constant dense<0.000000e+00> : vector<8x8xf32>
    %18 = tpu.matmul %16, %17, %cst_6 {dimension_numbers = #tpu.dot_dimension_numbers<[1], [1], [0], [0], [0, 0, 1, 0], [], []>} : vector<8x32xbf16>, vector<8x32xbf16>, vector<8x8xf32> -> vector<8x8xf32>
    %19 = arith.negf %18 : vector<8x8xf32>
    %20 = math.exp %19 : vector<8x8xf32>
    %cst_7 = arith.constant 1.000000e+00 : f32
    %21 = vector.broadcast %cst_7 : f32 to vector<8x8xf32>
    %22 = arith.addf %21, %20 : vector<8x8xf32>
    %23 = arith.divf %21, %22 : vector<8x8xf32>
    %c0_8 = arith.constant 0 : index
    %c0_9 = arith.constant 0 : index
    %c0_10 = arith.constant 0 : index
    %24 = vector.load %arg5[%c0_8, %c0_9, %c0_10] : memref<1x8x8xf32, #tpu.memory_space<vmem>>, vector<1x8x8xf32>
    %25 = vector.shape_cast %24 : vector<1x8x8xf32> to vector<8x8xf32>
    %26 = vector.shape_cast %23 : vector<8x8xf32> to vector<1x8x8xf32>
    tpu.vector_store %arg5[%c0_8, %c0_9, %c0_10], %26 {strides = array<i32>} : memref<1x8x8xf32, #tpu.memory_space<vmem>>, vector<1x8x8xf32>,
    %27 = math.exp %23 : vector<8x8xf32>
    %cst_11 = arith.constant dense<0.000000e+00> : vector<8xf32>
    %28 = vector.multi_reduction <add>, %27, %cst_11 [1] : vector<8x8xf32> to vector<8xf32>
    %29 = vector.shape_cast %28 : vector<8xf32> to vector<8x1xf32>
    %30 = tpu.reciprocal %29 {approx = true} : vector<8x1xf32> -> vector<8x1xf32>
    %31 = vector.broadcast %30 : vector<8x1xf32> to vector<8x8xf32>
    %32 = arith.mulf %27, %31 : vector<8x8xf32>
    %33 = arith.truncf %32 : vector<8x8xf32> to vector<8x8xbf16>
    %34 = arith.truncf %15 : vector<8x32xf32> to vector<8x32xbf16>
    %cst_12 = arith.constant dense<0.000000e+00> : vector<8x32xf32>
    %35 = tpu.matmul %33, %34, %cst_12 {dimension_numbers = #tpu.dot_dimension_numbers<[1], [0], [0], [1], [0, 0, 1, 1], [], []>} : vector<8x8xbf16>, vector<8x32xbf16>, vector<8x32xf32> -> vector<8x32xf32>
    %cst_13 = arith.constant dense<0.000000e+00> : vector<8xf32>
    %36 = vector.multi_reduction <add>, %35, %cst_13 [1] : vector<8x32xf32> to vector<8xf32>
    %37 = vector.shape_cast %36 : vector<8xf32> to vector<8x1xf32>
    %cst_14 = arith.constant 3.200000e+01 : f32
    %38 = vector.broadcast %cst_14 : f32 to vector<8x1xf32>
    %39 = arith.divf %37, %38 : vector<8x1xf32>
    %40 = vector.broadcast %39 : vector<8x1xf32> to vector<8x32xf32>
    %41 = arith.subf %35, %40 : vector<8x32xf32>
    %42 = arith.mulf %41, %41 : vector<8x32xf32>
    %cst_15 = arith.constant dense<0.000000e+00> : vector<8xf32>
    %43 = vector.multi_reduction <add>, %42, %cst_15 [1] : vector<8x32xf32> to vector<8xf32>
    %44 = vector.shape_cast %43 : vector<8xf32> to vector<8x1xf32>
    %cst_16 = arith.constant 3.200000e+01 : f32
    %45 = vector.broadcast %cst_16 : f32 to vector<8x1xf32>
    %46 = arith.divf %44, %45 : vector<8x1xf32>
    %47 = vector.broadcast %39 : vector<8x1xf32> to vector<8x32xf32>
    %48 = arith.subf %35, %47 : vector<8x32xf32>
    %cst_17 = arith.constant 9.99999974E-6 : f32
    %49 = vector.broadcast %cst_17 : f32 to vector<8x1xf32>
    %50 = arith.addf %46, %49 : vector<8x1xf32>
    %51 = math.rsqrt %50 : vector<8x1xf32>
    %52 = vector.broadcast %51 : vector<8x1xf32> to vector<8x32xf32>
    %53 = arith.mulf %48, %52 : vector<8x32xf32>
    %54 = vector.broadcast %4 : vector<1x32xf32> to vector<8x32xf32>
    %55 = arith.mulf %53, %54 : vector<8x32xf32>
    %56 = vector.broadcast %5 : vector<1x32xf32> to vector<8x32xf32>
    %57 = arith.addf %55, %56 : vector<8x32xf32>
    %c0_18 = arith.constant 0 : index
    %c0_19 = arith.constant 0 : index
    %c0_20 = arith.constant 0 : index
    %58 = vector.load %arg4[%c0_18, %c0_19, %c0_20] : memref<1x8x256xf32, #tpu.memory_space<vmem>>, vector<1x8x32xf32>
    %59 = vector.shape_cast %58 : vector<1x8x32xf32> to vector<8x32xf32>
    %60 = vector.shape_cast %57 : vector<8x32xf32> to vector<1x8x32xf32>
    tpu.vector_store %arg4[%c0_18, %c0_19, %c0_20], %60 {strides = array<i32>} : memref<1x8x256xf32, #tpu.memory_space<vmem>>, vector<1x8x32xf32>,
    %cst_21 = arith.constant dense<0.000000e+00> : vector<8xf32>
    %61 = vector.multi_reduction <add>, %1, %cst_21 [1] : vector<8x32xf32> to vector<8xf32>
    %62 = vector.shape_cast %61 : vector<8xf32> to vector<8x1xf32>
    %cst_22 = arith.constant 3.200000e+01 : f32
    %63 = vector.broadcast %cst_22 : f32 to vector<8x1xf32>
    %64 = arith.divf %62, %63 : vector<8x1xf32>
    %65 = vector.broadcast %64 : vector<8x1xf32> to vector<8x32xf32>
    %66 = arith.subf %1, %65 : vector<8x32xf32>
    %67 = arith.mulf %66, %66 : vector<8x32xf32>
    %cst_23 = arith.constant dense<0.000000e+00> : vector<8xf32>
    %68 = vector.multi_reduction <add>, %67, %cst_23 [1] : vector<8x32xf32> to vector<8xf32>
    %69 = vector.shape_cast %68 : vector<8xf32> to vector<8x1xf32>
    %cst_24 = arith.constant 3.200000e+01 : f32
    %70 = vector.broadcast %cst_24 : f32 to vector<8x1xf32>
    %71 = arith.divf %69, %70 : vector<8x1xf32>
    %72 = vector.broadcast %64 : vector<8x1xf32> to vector<8x32xf32>
    %73 = arith.subf %1, %72 : vector<8x32xf32>
    %cst_25 = arith.constant 9.99999974E-6 : f32
    %74 = vector.broadcast %cst_25 : f32 to vector<8x1xf32>
    %75 = arith.addf %71, %74 : vector<8x1xf32>
    %76 = math.rsqrt %75 : vector<8x1xf32>
    %77 = vector.broadcast %76 : vector<8x1xf32> to vector<8x32xf32>
    %78 = arith.mulf %73, %77 : vector<8x32xf32>
    %79 = vector.broadcast %6 : vector<1x32xf32> to vector<8x32xf32>
    %80 = arith.mulf %78, %79 : vector<8x32xf32>
    %81 = vector.broadcast %7 : vector<1x32xf32> to vector<8x32xf32>
    %82 = arith.addf %80, %81 : vector<8x32xf32>
    %c0_26 = arith.constant 0 : index
    %c0_27 = arith.constant 0 : index
    %c128 = arith.constant 128 : index
    %83 = vector.load %arg4[%c0_26, %c0_27, %c128] : memref<1x8x256xf32, #tpu.memory_space<vmem>>, vector<1x8x32xf32>
    %84 = vector.shape_cast %83 : vector<1x8x32xf32> to vector<8x32xf32>
    %85 = vector.shape_cast %82 : vector<8x32xf32> to vector<1x8x32xf32>
    tpu.vector_store %arg4[%c0_26, %c0_27, %c128], %85 {strides = array<i32>} : memref<1x8x256xf32, #tpu.memory_space<vmem>>, vector<1x8x32xf32>,
    return
  }
  func.func @transform_0(%arg0: i32) -> (i32, i32, i32) {
    %c0_i32 = arith.constant 0 : i32
    %c0_i32_0 = arith.constant 0 : i32
    %c0_i32_1 = arith.constant 0 : i32
    return %arg0, %c0_i32, %c0_i32_0 : i32, i32, i32
  }
  func.func @transform_1(%arg0: i32) -> (i32, i32) {
    %c0_i32 = arith.constant 0 : i32
    %c0_i32_0 = arith.constant 0 : i32
    %c0_i32_1 = arith.constant 0 : i32
    return %c0_i32, %c0_i32_0 : i32, i32
  }
  func.func @transform_2(%arg0: i32) -> (i32, i32) {
    %c0_i32 = arith.constant 0 : i32
    %c0_i32_0 = arith.constant 0 : i32
    %c0_i32_1 = arith.constant 0 : i32
    return %c0_i32, %c0_i32_0 : i32, i32
  }
  func.func @transform_3(%arg0: i32) -> (i32, i32, i32) {
    %c0_i32 = arith.constant 0 : i32
    %c0_i32_0 = arith.constant 0 : i32
    %c0_i32_1 = arith.constant 0 : i32
    return %arg0, %c0_i32, %c0_i32_0 : i32, i32, i32
  }
  func.func @transform_4(%arg0: i32) -> (i32, i32, i32) {
    %c0_i32 = arith.constant 0 : i32
    %c0_i32_0 = arith.constant 0 : i32
    %c0_i32_1 = arith.constant 0 : i32
    return %arg0, %c0_i32, %c0_i32_0 : i32, i32, i32
  }
}

</mosaic_0001>

<bundles_post_ra>
// kernel: tpu_custom_call.1
= control target key start
LH: loop header
LB: loop body
LE: loop exit
PB: predicated region body
PF: predicated region fallthrough
CT: control target
= control target key end

     0   :  { %10 = vsyncpa [#allocation3], 0  ;;  %s1384_s0 = inlined_call_operand.hbm [shape: f32[4,8,32], index: 0, kind: input, shape index: {}]   ;;  %s1385_s1 = inlined_call_operand.hbm [shape: bf16[32,512], index: 1, kind: input, shape index: {}]   ;;  %s1386_s2 = inlined_call_operand.hbm [shape: f32[8,512], index: 2, kind: input, shape index: {}]   ;;  %s1387_s3 = inlined_call_operand.hbm [shape: f32[4,8,256], index: 3, kind: output, shape index: {0}]   ;;  %s1388_s4 = inlined_call_operand.hbm [shape: f32[4,8,8], index: 4, kind: output, shape index: {1}]  }
   0x1   :  { %12 = vsyncpa [#allocation3 + $0x1], 0 }
   0x2   :  { %13 = vsyncpa [#allocation6], 0 }
   0x3   :  { %14 = vsyncpa [#allocation4], 0 }
   0x4   :  { %16 = vsyncpa [#allocation4 + $0x1], 0 }
   0x5   :  { %17 = vsyncpa [#allocation10], 0 }
   0x6   :  { %19 = vsyncpa [#allocation10 + $0x1], 0  ;;  %s1093_s15 = smov 0   ;;  %s1095_s16 = smov 0  }
   0x7   :  { %s1097_s17 = smov 0   ;;  %s1099_s18 = smov 0  }
   0x8 LB: > { %s1114_s19 = sadd.s32 4294967295, %s1056_s18   ;;  %s717_s20 = sadd.s32 4294967294, %s1056_s18   ;;  %s1056_s18 = sphi %s1099_s18, %s1407_s18   ;;  %s1052_s17 = sphi %s1097_s17, %s1406_s17   ;;  %s1048_s16 = sphi %s1095_s16, %s1405_s16   ;;  %s1044_s15 = sphi %s1093_s15, %s1404_s15  }
   0x9   : > { %p45_p0 = scmp.ne.s32.totalorder %s1048_s16, %s1044_s15  ;;  %p1389_p1 = scmp.eq.s32.totalorder %s1114_s19, 0 }
   0xa   : > { %p117_p3 = scmp.eq.s32.totalorder %s717_s20, 3  ;;  %p718_p5 = scmp.ge.s32.totalorder %s1056_s18, 1 }
   0xb   : > { %p1123_p4 = por %p1389_p1, %p45_p0  ;;  %p150_p7 = scmp.lt.s32.totalorder %s1056_s18, 5 }
   0xc   : > { %p1128_p6 = por %p117_p3, %p45_p0  ;;  %s1058_s24 = smov [#allocation5]  }
   0xd   : > { %s1392_s21 = scalar_select %p1123_p4, 1, 0 }
   0xe   : > { %s1393_s22 = scalar_select %p1128_p6, 1, 0 }
   0xf   : > { %p1133_p8 = pnand %p718_p5, %p150_p7  ;;  %s162_s25 = sshll.u32 %s1058_s24, 4  ;;  %s163_s25 = int_to_ptr.vmem [resolvable:$true] %s162_s25 }
  0x10   : > { %s1059_s27 = smov [#allocation7]   ;;  %s868_s5 = scalar_lea.hbm %s1385_s1, 1024 }
  0x11   : > { %s1394_s23 = scalar_select %p1133_p8, 1, 0 }
  0x12   : > { %p781_p9 = pneg %p1133_p8  ;;  %s176_s28 = sshll.u32 %s1059_s27, 4  ;;  %s1145_s28 = int_to_ptr.vmem [resolvable:$true] %s176_s28 }
  0x13   : > { %p869_p11 = scmp.ne.s32.totalorder %s1385_s1, %s868_s5  ;;  %p875_p3 = scmp.lt.u32.totalorder %s868_s5, %s1385_s1 }
  0x14   : > { %p1141_p10 = pnand %p781_p9, %p1389_p1 }
  0x16   : > { %p870_p12 = pneg %p1141_p10 }
  0x18   : > { %p871_p13 = pnand %p870_p12, %p869_p11 }
  0x1a   : > { %p872_p0 = pneg %p871_p13 }
  0x1c   : > { %p877_p5 = pnand %p875_p3, %p872_p0 }
  0x1e   : > { %880 = shalt.err (!%p877_p5)
}
  0x1f   : > { %s881_s10 = scalar_lea.vmem %s163_s25, 1024  ;;  %p889_p2 = scmp.lt.s32.totalorder %s163_s25, %s163_s25 }
  0x20   : > { %p882_p7 = scmp.ne.s32.totalorder %s163_s25, %s881_s10  ;;  %p890_p6 = scmp.lt.s32.totalorder %s881_s10, %s881_s10 }
  0x22   : > { %p884_p9 = pnand %p882_p7, %p870_p12  ;;  %p891_p4 = por %p890_p6, %p889_p2 }
  0x24   : > { %p885_p1 = pneg %p884_p9 }
  0x26   : > { %p892_p8 = pnand %p891_p4, %p885_p1 }
  0x28   : > { %895 = shalt.err (!%p892_p8)
}
  0x29   : > { %s1060_s11 = smov 256   ;;  %s1061_s12 = smov 16  }
  0x2a   : > { %784 = dma.hbm_to_vmem [thread:$0]  (!%p1141_p10), %s1385_s1, 1024, %s163_s25, [#allocation6], %s1060_s11, %s1060_s11, %s1061_s12  }
  0x2b   : > { %s896_s27 = scalar_lea.hbm %s1386_s2, 512 }
  0x2c   : > { %p897_p11 = scmp.ne.s32.totalorder %s1386_s2, %s896_s27  ;;  %p903_p4 = scmp.lt.u32.totalorder %s896_s27, %s1386_s2 }
  0x2e   : > { %p899_p1 = pnand %p897_p11, %p870_p12 }
  0x30   : > { %p900_p2 = pneg %p899_p1 }
  0x32   : > { %p905_p6 = pnand %p903_p4, %p900_p2 }
  0x34   : > { %908 = shalt.err (!%p905_p6)
}
  0x35   : > { %s909_s25 = scalar_lea.vmem %s1145_s28, 512  ;;  %p917_p3 = scmp.lt.s32.totalorder %s1145_s28, %s1145_s28 }
  0x36   : > { %p910_p8 = scmp.ne.s32.totalorder %s1145_s28, %s909_s25  ;;  %p918_p5 = scmp.lt.s32.totalorder %s909_s25, %s909_s25 }
  0x38   : > { %p912_p13 = pnand %p910_p8, %p870_p12  ;;  %p919_p7 = por %p918_p5, %p917_p3 }
  0x3a   : > { %p913_p0 = pneg %p912_p13 }
  0x3c   : > { %p920_p9 = pnand %p919_p7, %p913_p0 }
  0x3e   : > { %923 = shalt.err (!%p920_p9)
}
  0x3f   : > { %787 = dma.hbm_to_vmem [thread:$0]  (!%p1141_p10), %s1386_s2, 512, %s1145_s28, [#allocation6]  }
  0x40   : > { %s1195_s9 = sadd.s32 1, %s1056_s18   ;;  %s32_s26 = sadd.s32 1, %s1052_s17 }
  0x41   : > { %s29_s10 = ssub.s32 %s1056_s18, %s1195_s9  ;;  %p39_p12 = scmp.ne.s32.totalorder %s1052_s17, %s1048_s16 }
  0x42   : > { %p30_p11 = scmp.eq.s32.totalorder %s29_s10, 0  ;;  %p40_p1 = scmp.eq.s32.totalorder %s1056_s18, 0 }
  0x43   : > { %p1396_p2 = scmp.eq.s32.totalorder %s1114_s19, 3  ;;  %p801_p6 = scmp.lt.s32.totalorder %s1056_s18, 4 }
  0x44   : > { %s1211_s12 = scalar_select %p30_p11, %s1052_s17, %s32_s26  }
  0x45   : > { %p1205_p4 = por %p1396_p2, %p39_p12  ;;  %p41_p8 = por %p40_p1, %p39_p12 }
  0x46   : > { %s187_s13 = sand.u32 1, %s1052_s17   ;;  %s723_s28 = sshll.u32 %s1056_s18, 7 }
  0x47   : > { %s722_s14 = sshll.u32 %s187_s13, 3  ;;  %s1218_s27 = scalar_lea.hbm %s1384_s0, %s723_s28 }
  0x48   : > { %s191_s29 = scalar_lea.vmem [#allocation2], %s722_s14  ;;  %p1222_p10 = pnand %p801_p6, %p41_p8 }
  0x49   : > { %s198_s30 = sshll.u32 %s191_s29, 4  ;;  %s188_s6 = scalar_lea.sflag [#allocation3], %s187_s13  ;;  %s1220_s30 = int_to_ptr.vmem [resolvable:$true] %s198_s30 }
  0x4a   : > { %s924_s25 = scalar_lea.hbm %s1218_s27, 128  ;;  %p926_p0 = pneg %p1222_p10 }
  0x4b   : > { %p925_p13 = scmp.ne.s32.totalorder %s1218_s27, %s924_s25  ;;  %s929_s26 = scalar_lea.hbm %s1384_s0, 512 }
  0x4c   : > { %p930_p7 = scmp.lt.u32.totalorder %s1218_s27, %s1384_s0  ;;  %p931_p9 = scmp.lt.u32.totalorder %s929_s26, %s924_s25 }
  0x4d   : > { %p927_p3 = pnand %p926_p0, %p925_p13  ;;  %p933_p11 = scmp.lt.u32.totalorder %s924_s25, %s1218_s27 }
  0x4e   : > { %p932_p12 = por %p931_p9, %p930_p7 }
  0x4f   : > { %p928_p5 = pneg %p927_p3 }
  0x50   : > { %p934_p1 = por %p933_p11, %p932_p12 }
  0x52   : > { %p935_p2 = pnand %p934_p1, %p928_p5 }
  0x54   : > { %938 = shalt.err (!%p935_p2)
}
  0x55   : > { %s939_s13 = scalar_lea.vmem %s1220_s30, 128  ;;  %s1062_s28 = smov [#allocation2]  }
  0x56   : > { %p940_p6 = scmp.ne.s32.totalorder %s1220_s30, %s939_s13  ;;  %s944_s20 = sshll.u32 %s1062_s28, 4  ;;  %s945_s20 = int_to_ptr.vmem [resolvable:$false] %s944_s20 }
  0x57   : > { %s946_s24 = scalar_lea.vmem %s945_s20, 256  ;;  %p947_p3 = scmp.lt.s32.totalorder %s1220_s30, %s945_s20 }
  0x58   : > { %p942_p8 = pnand %p940_p6, %p926_p0  ;;  %p948_p7 = scmp.lt.s32.totalorder %s946_s24, %s939_s13 }
  0x5a   : > { %p943_p13 = pneg %p942_p8  ;;  %p949_p9 = por %p948_p7, %p947_p3 }
  0x5c   : > { %p950_p12 = pnand %p949_p9, %p943_p13 }
  0x5e   : > { %953 = shalt.err (!%p950_p12)
}
  0x5f   : > { %791 = dma.hbm_to_vmem [thread:$0]  (!%p1222_p10), %s1218_s27, 128, %s1220_s30, %s188_s6  }
  0x60   : > { %p1399_p5 = scmp.ne.s32.totalorder %s1394_s23, 0 }
  0x61   : > { %s1254_s29 = sand.u32 (!%p1399_p5), 1, %s1048_s16   ;;  %p1400_p0 = scmp.ne.s32.totalorder (!%p1399_p5), %s1392_s21, 0 }
  0x62   : > { %207 = sbr.rel (%p1399_p5) target bundleno = 1292 (0x50c), region = 32  ;;  %s725_s25 = sshll.u32 (!%p1399_p5), %s1254_s29, 3 }
  0x63   : > { %s210_s7 = scalar_lea.sflag (!%p1399_p5), [#allocation3], %s1254_s29  ;;  %s213_s8 = scalar_lea.vmem (!%p1399_p5), [#allocation2], %s725_s25 }
  0x69   : > { %1027 = dma.done.wait (%p1400_p0), %s210_s7, 128  }
  0x6a   : > { %1029 = vsyncadd (%p1400_p0), %s210_s7, 4294967168  ;;  %p1401_p10 = scmp.eq.s32.totalorder %s1114_s19, 0 }
  0x6c   : > { %1031 = dma.done.wait (%p1401_p10), [#allocation6], 1536   ;;  %p1402_p11 = pmov %p1401_p10 }
  0x6d   : > { %v1063_v0 = vmov 0   ;;  %v844_v1 = vld [vmem:[#allocation5 + $0x4] ss:$16 sps:$4 sm:$0xff]   ;;  %v846_v2 = vld [vmem:[#allocation5] ss:$16 sps:$4 sm:$0xff]   ;;  %vm317_vm0 = vcmask 261120   ;;  %v265_v12 = vlaneseq }
  0x6e   : > { %1033 = vsyncadd (%p1402_p11), [#allocation6], 4294965760  ;;  %353 = vmatprep.mubr.bf16.mxu0 %v1063_v0  ;;  %394 = vmatprep.mubr.bf16.mxu1 %v1063_v0  ;;  %v847_v3 = vld [vmem:[#allocation5 + $0x24] ss:$16 sps:$4 sm:$0xff]   ;;  %v849_v4 = vld [vmem:[#allocation5 + $0x20] ss:$16 sps:$4 sm:$0xff]  }
  0x6f   : > { %321 = vmatprep.subr.bf16.mxu0 %v844_v1  ;;  %v1268_v5 = vld [vmem:[%s213_s8] sm:$0xff]  ;;  %v1064_v7 = vmov 0.0   ;;  %vm1065_vm1 = vmmov 0   ;;  %v1274_v13 = vshrl.u32 %v265_v12, 7  ;;  %v254_v15 = vld [vmem:[#allocation7 + $0x8] sm:$0xff]  ;;  %v1277_v18 = vld [vmem:[#allocation7] sm:$0xff] }
  0x70   : > { %322 = vmatpush1.bf16.msra.mxu0 %v846_v2  ;;  %v256_v6 = vpack.c.bf16 %v1268_v5, %v1268_v5  ;;  %v850_v8 = vld [vmem:[#allocation5 + $0xc] ss:$16 sps:$4 sm:$0xff]   ;;  %v852_v9 = vld [vmem:[#allocation5 + $0x8] ss:$16 sps:$4 sm:$0xff]   ;;  %v255_v28 = vld [vmem:[#allocation7 + $0x10] sm:$0xff]  ;;  %vm470_vm2 = vcmask 1043456  }
  0x71   : > { %323 = vmatprep.subr.bf16.mxu0 %v847_v3  ;;  %v853_v10 = vld [vmem:[#allocation5 + $0x2c] ss:$16 sps:$4 sm:$0xff]   ;;  %362 = vmatprep.subr.bf16.mxu1 %v850_v8  ;;  %v855_v11 = vld [vmem:[#allocation5 + $0x28] ss:$16 sps:$4 sm:$0xff]   ;;  %v267_v14 = vsub.s32 0, %v1274_v13  ;;  %vm456_vm3 = vcmask 64512  }
  0x72   : > { %363 = vmatpush1.bf16.msra.mxu1 %v852_v9  ;;  %s1284_s21 = scalar_lea.vmem [#allocation9], %s725_s25  ;;  %v539_v48 = vsel %vm317_vm0, %v1268_v5, 0.0  ;;  %v559_v8 = vsub.s32 4, %v1274_v13  ;;  %s728_s23 = sshll.u32 %s1254_s29, 4 }
  0x73   : > { %364 = vmatprep.subr.bf16.mxu1 %v853_v10  ;;  %v272_v16 = vrot.slane %v254_v15, %v267_v14  ;;  %v268_v23 = vrot.slane %v1277_v18, %v267_v14  ;;  %v276_v30 = vrot.slane %v255_v28, %v267_v14  ;;  %540 = vadd.xlane.f32.xlu1 %v539_v48  ;;  %s1301_s27 = scalar_lea.vmem [#allocation8], %s728_s23  ;;  %s747_s30 = sshll.u32 %s1114_s19, 7 }
  0x74   : > { %324 = vmatpush1.bf16.msra.mxu0 %v849_v4  ;;  %s596_s5 = sshll.u32 %s1284_s21, 4  ;;  %s1310_s10 = scalar_lea.hbm %s1388_s4, %s747_s30  ;;  %s597_s5 = int_to_ptr.vmem [resolvable:$true] %s596_s5 }
  0x75   : > { %755 = vmatprep.subr.bf16.mxu0 %v1064_v7  ;;  %s569_s14 = scalar_lea.sflag [#allocation10], %s1254_s29  ;;  %s954_s13 = scalar_lea.vmem %s597_s5, 128 }
  0x76   : > { %365 = vmatpush1.bf16.msra.mxu1 %v855_v11  ;;  %v560_v11 = vrot.slane %v1277_v18, %v559_v8  ;;  %p955_p1 = scmp.ne.s32.totalorder %s597_s5, %s954_s13  ;;  %s1066_s28 = smov [#allocation9]  }
  0x77   : > { %738 = vmatmul.mubr.msk.bf16.vlgmr.msra.gmra.mrb[0].mxu0 %vm317_vm0, %v256_v6  ;;  %761 = vmatprep.subr.bf16.mxu1 %v1064_v7  ;;  %s958_s20 = sshll.u32 %s1066_s28, 4  ;;  %s959_s20 = int_to_ptr.vmem [resolvable:$false] %s958_s20 }
  0x78   : > { %757 = vmatprep.mubr.msk.bf16.mxu0 %vm1065_vm1, %v1064_v7  ;;  %p956_p2 = pnand %p955_p1, %p1205_p4  ;;  %s960_s24 = scalar_lea.vmem %s959_s20, 256 }
  0x79   : > { %739 = vmatmul.mubr.msk.bf16.vlgmr.msra.gmra.mrb[0].mxu1 %vm317_vm0, %v256_v6  ;;  %p961_p8 = scmp.lt.s32.totalorder %s597_s5, %s959_s20  ;;  %p962_p13 = scmp.lt.s32.totalorder %s960_s24, %s954_s13 }
  0x7a   : > { %763 = vmatprep.mubr.msk.bf16.mxu1 %vm1065_vm1, %v1064_v7  ;;  %v554_v7 = vsub.s32 3, %v1274_v13  ;;  %p957_p6 = pneg %p956_p2 }
  0x7b   : > { %p963_p3 = por %p962_p13, %p961_p8 }
  0x7c   : > { %v555_v9 = vrot.slane %v1277_v18, %v554_v7 }
  0x7d   : > { %p964_p7 = pnand %p963_p3, %p957_p6 }
 0x100   : > { %v541_v53 = vpop.xlane.xlu1 %540 }
 0x101   : > { %v542_v54 = vmul.f32 0.03125, %v541_v53 }
 0x103   : > { %v543_v55 = vsub.f32 %v1268_v5, %v542_v54 }
 0x105   : > { %v544_v56 = vmul.f32 %v543_v55, %v543_v55 }
 0x107   : > { %v545_v62 = vsel %vm317_vm0, %v544_v56, 0.0 }
 0x14a   : > { %v355_v17 = vpop.f32.mrb[0].mxu0 }
 0x14b   : > { %v357_v19 = vpop.f32.mrb[1].mxu0  ;;  %v356_v26 = vadd.f32 %v355_v17, %v268_v23 }
 0x14c   : > { %v358_v20 = vadd.f32 %v357_v19, %v272_v16  ;;  %v359_v21 = vpop.f32.mrb[2].mxu0  ;;  %v396_v29 = vpop.f32.mrb[0].mxu1 }
 0x14d   : > { %v360_v22 = vpop.f32.mrb[3].mxu0  ;;  %v402_v27 = vpack.c.bf16 %v356_v26, %v356_v26  ;;  %v398_v31 = vpop.f32.mrb[1].mxu1  ;;  %v397_v33 = vadd.f32 %v396_v29, %v276_v30 }
 0x14e   : > { %v403_v24 = vpack.c.bf16 %v358_v20, %v358_v20  ;;  %v399_v32 = vpop.f32.mrb[2].mxu1 }
 0x14f   : > { %v400_v34 = vpop.f32.mrb[3].mxu1  ;;  %v466_v35 = vpack.c.bf16 %v397_v33, %v397_v33 }
 0x150   : > { %v408_v25 = vsel %vm317_vm0, %v403_v24, 0 }
 0x151   : > { %756 = vmatpush3.bf16.xpose.msra.mxu0 %v408_v25  ;;  %v472_v36 = vsel %vm470_vm2, %v466_v35, 0 }
 0x152   : > { %762 = vmatpush3.bf16.msra.mxu1 %v472_v36 }
 0x158   : > { %758 = vmatmul.mubr.msk.bf16.vlgmr.msra.gmra.mrb[4].mxu0 %vm317_vm0, %v402_v27 }
 0x22b   : > { %v444_v37 = vpop.f32.mrb[4].mxu0 }
 0x22c   : > { %v741_v38 = vmul.f32 -1.442695, %v444_v37  ;;  %v759_v39 = vpop.f32.mrb[5].mxu0 }
 0x22d   : > { %v447_v40 = vpop.f32.mrb[6].mxu0 }
 0x22e   : > { %856 = vpow2.f32 %v741_v38  ;;  %v760_v41 = vpop.f32.mrb[7].mxu0 }
 0x238   : > { %v857_v42 = vpop.eup %856 }
 0x239   : > { %v453_v43 = vadd.f32 1.0, %v857_v42 }
 0x23b   : > { %858 = vrcp.f32 %v453_v43 }
 0x245   : > { %v859_v44 = vpop.eup %858 }
 0x246   : > { %v458_v45 = vmul.f32 1.442695, %v859_v44  ;;  %457 = vst.msk [vmem:[%s1284_s21] sm:$0xff] %vm456_vm3, %v859_v44 }
 0x248   : > { %860 = vpow2.f32 %v458_v45 }
 0x252   : > { %v861_v46 = vpop.eup %860 }
 0x253   : > { %v460_v47 = vsel %vm456_vm3, %v861_v46, 0.0 }
 0x254   : > { %461 = vadd.xlane.f32.xlu0 %v460_v47 }
 0x2e1   : > { %v462_v49 = vpop.xlane.xlu0 %461 }
 0x2e2   : > { %862 = vrcp.f32 %v462_v49 }
 0x2ec   : > { %v863_v50 = vpop.eup %862 }
 0x2ed   : > { %v464_v51 = vmul.f32 %v863_v50, %v861_v46 }
 0x2ef   : > { %v465_v52 = vpack.c.bf16 %v464_v51, %v464_v51 }
 0x2f1   : > { %764 = vmatmul.mubr.msk.bf16.vlgmr.msra.gmra.mrb[4].mxu1 %vm456_vm3, %v465_v52 }
 0x3c4   : > { %v508_v57 = vpop.f32.mrb[4].mxu1 }
 0x3c5   : > { %v765_v58 = vpop.f32.mrb[5].mxu1  ;;  %v514_v59 = vsel %vm317_vm0, %v508_v57, 0.0 }
 0x3c6   : > { %515 = vadd.xlane.f32.xlu0 %v514_v59  ;;  %v511_v60 = vpop.f32.mrb[6].mxu1 }
 0x3c7   : > { %v766_v61 = vpop.f32.mrb[7].mxu1 }
 0x3ca   : > { %546 = vadd.xlane.f32.xlu0 %v545_v62 }
 0x453   : > { %v516_v63 = vpop.xlane.xlu0 %515 }
 0x454   : > { %v518_v0 = vmul.f32 0.03125, %v516_v63 }
 0x456   : > { %v519_v1 = vsub.f32 %v508_v57, %v518_v0 }
 0x457   : > { %v547_v2 = vpop.xlane.xlu0 %546 }
 0x458   : > { %v548_v3 = vmul.f32 0.03125, %v547_v2  ;;  %v520_v4 = vmul.f32 %v519_v1, %v519_v1 }
 0x45a   : > { %v549_v5 = vadd.f32 1e-05, %v548_v3  ;;  %v521_v6 = vsel %vm317_vm0, %v520_v4, 0.0 }
 0x45b   : > { %522 = vadd.xlane.f32.xlu1 %v521_v6 }
 0x45c   : > { %864 = vrsqrt.f32 %v549_v5 }
 0x466   : > { %v865_v10 = vpop.eup %864 }
 0x467   : > { %v551_v12 = vmul.f32 %v865_v10, %v543_v55 }
 0x469   : > { %v556_v14 = vmul.f32 %v555_v9, %v551_v12 }
 0x46b   : > { %v561_v15 = vadd.f32 %v560_v11, %v556_v14 }
 0x46d   : > { %562 = vst.msk [vmem:[%s1301_s27 + $0x8] sm:$0xff] %vm317_vm0, %v561_v15 }
 0x46e   : > { %967 = shalt.err (!%p964_p7)
}
 0x46f   : > { %s968_s25 = scalar_lea.hbm %s1310_s10, 128  ;;  %s972_s21 = scalar_lea.hbm %s1388_s4, 512 }
 0x470   : > { %p969_p9 = scmp.ne.s32.totalorder %s1310_s10, %s968_s25  ;;  %p973_p0 = scmp.lt.u32.totalorder %s1310_s10, %s1388_s4 }
 0x471   : > { %p974_p10 = scmp.lt.u32.totalorder %s972_s21, %s968_s25  ;;  %p976_p1 = scmp.lt.u32.totalorder %s968_s25, %s1310_s10 }
 0x472   : > { %p970_p12 = pnand %p969_p9, %p1205_p4 }
 0x473   : > { %p975_p11 = por %p974_p10, %p973_p0 }
 0x474   : > { %p971_p5 = pneg %p970_p12 }
 0x475   : > { %p977_p2 = por %p976_p1, %p975_p11 }
 0x477   : > { %p978_p6 = pnand %p977_p2, %p971_p5 }
 0x479   : > { %981 = shalt.err (!%p978_p6)
}
 0x47a   : > { %778 = dma.vmem_to_hbm [thread:$0]  (%p1205_p4), %s597_s5, 128, %s1310_s10, %s569_s14   ;;  %v530_v20 = vsub.s32 1, %v1274_v13  ;;  %v535_v21 = vsub.s32 2, %v1274_v13 }
 0x47b   : > { %s750_s6 = sshll.u32 %s1114_s19, 8  ;;  %s583_s26 = sshll.u32 %s1301_s27, 4  ;;  %s1341_s26 = int_to_ptr.vmem [resolvable:$true] %s583_s26 }
 0x47c   : > { %v531_v22 = vrot.slane %v1277_v18, %v530_v20  ;;  %v536_v24 = vrot.slane %v1277_v18, %v535_v21  ;;  %s1339_s14 = scalar_lea.hbm %s1387_s3, %s750_s6  ;;  %s564_s13 = scalar_lea.sflag [#allocation4], %s1254_s29 }
 0x47d   : > { %s982_s28 = scalar_lea.vmem %s1341_s26, 256  ;;  %s1067_s19 = smov [#allocation8]  }
 0x47e   : > { %p983_p8 = scmp.ne.s32.totalorder %s1341_s26, %s982_s28  ;;  %s986_s20 = sshll.u32 %s1067_s19, 4  ;;  %s987_s20 = int_to_ptr.vmem [resolvable:$false] %s986_s20 }
 0x47f   : > { %s988_s24 = scalar_lea.vmem %s987_s20, 512  ;;  %p989_p7 = scmp.lt.s32.totalorder %s1341_s26, %s987_s20 }
 0x480   : > { %p984_p13 = pnand %p983_p8, %p1205_p4  ;;  %p990_p9 = scmp.lt.s32.totalorder %s988_s24, %s982_s28 }
 0x482   : > { %p985_p3 = pneg %p984_p13  ;;  %p991_p12 = por %p990_p9, %p989_p7 }
 0x484   : > { %p992_p5 = pnand %p991_p12, %p985_p3 }
 0x4e8   : > { %v523_v16 = vpop.xlane.xlu1 %522 }
 0x4e9   : > { %v524_v17 = vmul.f32 0.03125, %v523_v16 }
 0x4eb   : > { %v525_v19 = vadd.f32 1e-05, %v524_v17 }
 0x4ed   : > { %866 = vrsqrt.f32 %v525_v19 }
 0x4f7   : > { %v867_v23 = vpop.eup %866 }
 0x4f8   : > { %v527_v25 = vmul.f32 %v867_v23, %v519_v1 }
 0x4fa   : > { %v532_v26 = vmul.f32 %v531_v22, %v527_v25 }
 0x4fc   : > { %v537_v27 = vadd.f32 %v536_v24, %v532_v26 }
 0x4fe   : > { %538 = vst.msk [vmem:[%s1301_s27] sm:$0xff] %vm317_vm0, %v537_v27 }
 0x4ff   : > { %995 = shalt.err (!%p992_p5)
}
 0x500   : > { %s996_s29 = scalar_lea.hbm %s1339_s14, 256  ;;  %s1000_s7 = scalar_lea.hbm %s1387_s3, 1024 }
 0x501   : > { %p997_p0 = scmp.ne.s32.totalorder %s1339_s14, %s996_s29  ;;  %p1001_p1 = scmp.lt.u32.totalorder %s1339_s14, %s1387_s3 }
 0x502   : > { %p1002_p2 = scmp.lt.u32.totalorder %s1000_s7, %s996_s29  ;;  %p1004_p8 = scmp.lt.u32.totalorder %s996_s29, %s1339_s14 }
 0x503   : > { %p998_p10 = pnand %p997_p0, %p1205_p4 }
 0x504   : > { %p1003_p6 = por %p1002_p2, %p1001_p1 }
 0x505   : > { %p999_p11 = pneg %p998_p10 }
 0x506   : > { %p1005_p13 = por %p1004_p8, %p1003_p6 }
 0x508   : > { %p1006_p3 = pnand %p1005_p13, %p999_p11 }
 0x50a   : > { %1009 = shalt.err (!%p1006_p3)
}
 0x50b   : > { %777 = dma.vmem_to_hbm [thread:$0]  (%p1205_p4), %s1341_s26, 256, %s1339_s14, %s564_s13  }
 0x50c PF: > { %p804_p7 = scmp.ge.s32.totalorder %s1056_s18, 2  ;;  %s608_s23 = sand.u32 1, %s1044_s15  }
 0x50d   : > { %p1403_p9 = scmp.ne.s32.totalorder %s1393_s22, 0  ;;  %s609_s30 = scalar_lea.sflag [#allocation4], %s608_s23 }
 0x50f   : > { %p793_p12 = pnand %p804_p7, %p1403_p9 }
 0x511   : > { %1035 = dma.done.wait (!%p793_p12), %s609_s30, 256  }
 0x512   : > { %1037 = vsyncadd (!%p793_p12), %s609_s30, 4294967040  ;;  %s618_s6 = scalar_lea.sflag [#allocation10], %s608_s23 }
 0x513   : > { %1039 = dma.done.wait (!%p793_p12), %s618_s6, 128  }
 0x514   : > { %1041 = vsyncadd (!%p793_p12), %s618_s6, 4294967168  ;;  %p22_p4 = scmp.ge.s32.totalorder %s1195_s9, 6   ;;  %s1404_s15 = smov %s1048_s16 }
 0x515   : > { %s1405_s16 = smov %s1052_s17  ;;  %s1406_s17 = smov %s1211_s12 }
 0x516   : > { %s1407_s18 = smov %s1195_s9  ;;  %24 = sbr.rel (!%p22_p4) target bundleno = 8 (0x8), region = 102 }
 0x51d   :  { %623 = vsyncpa [#allocation3], 1 }
 0x51e   :  { %625 = vsyncpa [#allocation3 + $0x1], 1 }
 0x51f   :  { %626 = vsyncpa [#allocation6], 1 }
 0x520   :  { %627 = vsyncpa [#allocation4], 1 }
 0x521   :  { %629 = vsyncpa [#allocation4 + $0x1], 1 }
 0x522   :  { %630 = vsyncpa [#allocation10], 1 }
 0x523   :  { %632 = vsyncpa [#allocation10 + $0x1], 1 }

</bundles_post_ra>
